<compile_context>
chip_gen: v7x
topology: tpu7x:2x2x1
jax: 0.10.0
libtpu: 0.0.40
codegen_flags: <defaults>
</compile_context>

<pallas_src>
import functools

import jax
import jax.numpy as jnp
from jax.experimental import pallas as pl
from jax.experimental.pallas import tpu as pltpu


def _vmem_limit_bytes():
    # Generation-aware scoped-VMEM budget: ~75% of physical, capped at 100 MiB.
    # v5e/v6e (128 MiB physical) -> 96 MiB ; v7x (64 MiB) -> 48 MiB.
    try:
        cap = int(pltpu.get_tpu_info().vmem_capacity_bytes)
        return min((cap * 3) // 4, 100 * 1024 * 1024)
    except Exception:
        return 48 * 1024 * 1024


def _pick_h_tile(Ho, Wo, Coutp, budget_bytes):
    """Largest TH dividing Ho such that the f32 (TH*Wo, Coutp) working tile fits the
    budget and TH*Wo is a multiple of 128 (lane-dense store after the transpose)."""
    cap = max(1, min(Ho, budget_bytes // max(1, Wo * Coutp * 4)))
    for th in range(cap, 0, -1):
        if Ho % th == 0 and (th * Wo) % 128 == 0:
            return th
    # Fallback: full height (block dims then equal the full array dims -> always legal).
    return Ho


# --------------------------------------------------------------------------------------
# Fused kernel: sweep 0 = conv + batch stats, sweep 1 = conv + normalize + NCHW store.
# --------------------------------------------------------------------------------------
def _cb_fused_kernel(x_ref, w_ref, gb_ref, o_ref, stats_ref, ss_ref, *,
                     kH_eff, TH, Wo, F, Cout, eps, inv_count):
    """Grid = (sweep, image n, tile of TH output rows).

    x_ref:     (1, Hx, Wo, F)       width-im2col'd image n (bf16), F = fold*Cin
    w_ref:     (kH_eff, F, Coutp)   folded conv taps (bf16), resident
    gb_ref:    (2, Coutp)           [gamma ; beta] (f32), resident
    o_ref:     (1, Cout, TH*Wo)     final NCHW output tile (f32), written in sweep 1 only
    stats_ref: (2, Coutp)           f32 [sum ; sum_of_squares] scratch (whole grid)
    ss_ref:    (2, Coutp)           f32 [scale ; shift] scratch (computed once)
    """
    s = pl.program_id(0)         # 0: statistics sweep, 1: normalize sweep
    n = pl.program_id(1)
    h = pl.program_id(2)
    TM = TH * Wo
    Coutp = w_ref.shape[-1]

    # Direct conv: kH_eff shifted-row matmuls contracting the folded (kW*Cin) axis.
    row0 = h * TH
    acc = jnp.zeros((TM, Coutp), jnp.float32)
    for di in range(kH_eff):                                   # static, unrolled
        xs = x_ref[0, pl.ds(row0 + di, TH), :, :]              # (TH, Wo, F) bf16
        acc = acc + jnp.dot(xs.reshape(TM, F), w_ref[di],
                            preferred_element_type=jnp.float32)

    # ---- sweep 0: accumulate per-channel sum / sum-of-squares --------------------------
    @pl.when((s == 0) & (n == 0) & (h == 0))
    def _init():
        stats_ref[...] = jnp.zeros_like(stats_ref)

    @pl.when(s == 0)
    def _stats():
        ssum = jnp.sum(acc, axis=0, keepdims=True)             # (1, Coutp)
        ssq = jnp.sum(acc * acc, axis=0, keepdims=True)        # (1, Coutp)
        stats_ref[...] += jnp.concatenate([ssum, ssq], axis=0)

    # ---- sweep boundary: fold batch stats + gamma/beta into per-channel scale/shift ----
    @pl.when((s == 1) & (n == 0) & (h == 0))
    def _fold():
        mean = stats_ref[0:1, :] * inv_count
        # TODO(synk): one-pass variance (E[x^2]-mean^2) can cancel for large-mean
        # activations at scale; switch to a centered second stats sweep if needed.
        var = jnp.maximum(stats_ref[1:2, :] * inv_count - mean * mean, 0.0)
        inv = jax.lax.rsqrt(var + jnp.float32(eps))
        scale = gb_ref[0:1, :] * inv
        shift = gb_ref[1:2, :] - mean * scale
        ss_ref[...] = jnp.concatenate([scale, shift], axis=0)

    # ---- sweep 1: normalize, transpose to channel-major, store final NCHW tile ---------
    @pl.when(s == 1)
    def _apply():
        y = acc * ss_ref[0:1, :] + ss_ref[1:2, :]              # (TM, Coutp) f32
        # XLU transpose rides an otherwise-idle slot; store is lane-dense (TM % 128 == 0).
        o_ref[0, :, :] = y.T[:Cout, :]                         # (Cout, TM)


# --------------------------------------------------------------------------------------
# Wrapper
# --------------------------------------------------------------------------------------
def cb_forward(x, weight, gamma, beta, *, stride=1, eps=1e-3):
    """x: (N, Cin, H, W) f32 NCHW; weight: (Cout, Cin, kH, kW); gamma/beta: (Cout,).
    Returns (N, Cout, Ho, Wo) f32 NCHW (same as the PyTorch CB module)."""
    N, Cin, H, W = x.shape
    Cout, _, kH, kW = weight.shape
    # TODO(synk): single `pad` assumes an odd square kernel, which CB always uses.
    pad = (kH - 1) // 2
    Ho = (H + 2 * pad - kH) // stride + 1
    Wo = (W + 2 * pad - kW) // stride + 1
    M = N * Ho * Wo
    Coutp = ((Cout + 127) // 128) * 128            # lane-dense weight / accumulator cols

    # ---- layout prep: spatial pad + NHWC + width-only im2col (kW-fold, bf16) ----------
    xp = jnp.pad(x, ((0, 0), (0, 0), (pad, pad), (pad, pad)))
    xp = xp.transpose(0, 2, 3, 1).astype(jnp.bfloat16)         # (N, Hp, Wp, Cin)
    if stride == 1:
        # (N, Hp, Wo, kW*Cin): column jo, fold index dj*Cin + c  <-  xp[:, :, jo+dj, c]
        xw = jnp.concatenate([xp[:, :, dj:dj + Wo, :] for dj in range(kW)], axis=-1)
        kH_eff = kH
        w = weight.transpose(2, 3, 1, 0).reshape(kH, kW * Cin, Cout)
    else:
        # stride > 1: full im2col with rows already indexed by output row -> one matmul,
        # no strided slicing inside the kernel.
        cols = [xp[:, di:di + (Ho - 1) * stride + 1:stride,
                   dj:dj + (Wo - 1) * stride + 1:stride, :]
                for di in range(kH) for dj in range(kW)]
        xw = jnp.concatenate(cols, axis=-1)                    # (N, Ho, Wo, kH*kW*Cin)
        kH_eff = 1
        w = weight.transpose(2, 3, 1, 0).reshape(1, kH * kW * Cin, Cout)
    F = xw.shape[-1]
    Hx = xw.shape[1]
    w = jnp.pad(w, ((0, 0), (0, 0), (0, Coutp - Cout))).astype(jnp.bfloat16)

    gamma_p = jnp.pad(gamma.astype(jnp.float32), (0, Coutp - Cout))
    beta_p = jnp.pad(beta.astype(jnp.float32), (0, Coutp - Cout))
    gb = jnp.stack([gamma_p, beta_p], axis=0)                  # (2, Coutp)

    vmem_limit = _vmem_limit_bytes()
    TH = _pick_h_tile(Ho, Wo, Coutp, budget_bytes=max(2 << 20, vmem_limit // 16))
    n_h = Ho // TH
    TM = TH * Wo

    kernel = functools.partial(
        _cb_fused_kernel, kH_eff=kH_eff, TH=TH, Wo=Wo, F=F, Cout=Cout,
        eps=float(eps), inv_count=1.0 / float(M))

    out3d = pl.pallas_call(
        kernel,
        out_shape=jax.ShapeDtypeStruct((N, Cout, Ho * Wo), jnp.float32),
        grid_spec=pltpu.PrefetchScalarGridSpec(
            num_scalar_prefetch=0,
            grid=(2, N, n_h),      # sweep 0: stats ; sweep 1: normalize + write
            in_specs=[
                # Full (width-im2col'd) image per n; constant across h -> no re-DMA per h.
                # TODO(synk): row-band input blocks (height TH + kH - 1) for very large
                # feature maps on v7x's 64 MiB VMEM; full image per n is fine here.
                pl.BlockSpec((1, Hx, Wo, F), lambda s, n, h: (n, 0, 0, 0)),
                pl.BlockSpec((kH_eff, F, Coutp), lambda s, n, h: (0, 0, 0)),
                pl.BlockSpec((2, Coutp), lambda s, n, h: (0, 0)),
            ],
            # Output block index is held constant at (0,0,0) through sweep 0 (never
            # written there, so no garbage writeback); real NCHW blocks during sweep 1.
            out_specs=pl.BlockSpec((1, Cout, TM), lambda s, n, h: (s * n, 0, s * h)),
            scratch_shapes=[
                pltpu.VMEM((2, Coutp), jnp.float32),   # [sum ; sum_of_squares]
                pltpu.VMEM((2, Coutp), jnp.float32),   # [scale ; shift]
            ],
        ),
        compiler_params=pltpu.CompilerParams(
            # Stats / scale-shift scratch carried across the whole grid -> all arbitrary.
            # TODO(synk): v7x megacore split (per-core partial stats + cross-core reduce).
            dimension_semantics=("arbitrary", "arbitrary", "arbitrary"),
            vmem_limit_bytes=vmem_limit,
        ),
        cost_estimate=pl.CostEstimate(
            flops=2 * (2 * M * kH * kW * Cin * Coutp),
            transcendentals=Coutp,
            bytes_accessed=(2 * xw.size * 2 + w.size * 2 + gb.size * 4
                            + N * Cout * Ho * Wo * 4),
        ),
    )(xw, w, gb)

    # (N, Cout, Ho*Wo) -> (N, Cout, Ho, Wo): free metadata reshape, no extra HBM pass.
    return out3d.reshape(N, Cout, Ho, Wo)


# --------------------------------------------------------------------------------------
# Reference (matched precision: bf16 conv operands, f32 accumulation, f32 batch-norm).
# --------------------------------------------------------------------------------------
def _reference(x, weight, gamma, beta, *, stride=1, eps=1e-3):
    pad = (weight.shape[2] - 1) // 2
    conv = jax.lax.conv_general_dilated(
        x.astype(jnp.bfloat16), weight.astype(jnp.bfloat16),
        window_strides=(stride, stride),
        padding=((pad, pad), (pad, pad)),
        dimension_numbers=("NCHW", "OIHW", "NCHW"),
        preferred_element_type=jnp.float32,
    )
    mean = jnp.mean(conv, axis=(0, 2, 3), keepdims=True)
    var = jnp.mean((conv - mean) ** 2, axis=(0, 2, 3), keepdims=True)  # biased
    xhat = (conv - mean) * jax.lax.rsqrt(var + eps)
    return xhat * gamma.reshape(1, -1, 1, 1) + beta.reshape(1, -1, 1, 1)


if __name__ == "__main__":
    # Small shapes consistent with CB(nIn=4, nOut=8, kSize=3, stride=1)
    N, Cin, H, W = 2, 4, 16, 16
    Cout, kSize, stride = 8, 3, 1

    key = jax.random.PRNGKey(0)
    k_x, k_w, k_g, k_b = jax.random.split(key, 4)
    x = jax.random.normal(k_x, (N, Cin, H, W), dtype=jnp.float32)
    weight = jax.random.normal(k_w, (Cout, Cin, kSize, kSize), dtype=jnp.float32) * 0.1
    gamma = jax.random.uniform(k_g, (Cout,), dtype=jnp.float32, minval=0.5, maxval=1.5)
    beta = jax.random.normal(k_b, (Cout,), dtype=jnp.float32) * 0.1

    cb = jax.jit(functools.partial(cb_forward, stride=stride, eps=1e-3))
    out = jax.block_until_ready(cb(x, weight, gamma, beta))

    ref = _reference(x, weight, gamma, beta, stride=stride, eps=1e-3)
    assert out.shape == (N, Cout, H, W), out.shape
    err = float(jnp.max(jnp.abs(out - ref)))
    assert err < 5e-3, err
    print("KERNEL_OK")
</pallas_src>

<mosaic_0001>
module attributes {stable_mosaic.version = 11 : i64} {
  func.func @_cb_fused_kernel(%arg0: i32, %arg1: i32, %arg2: i32, %arg3: memref<1x18x16x12xbf16, #tpu.memory_space<vmem>>, %arg4: memref<3x12x128xbf16, #tpu.memory_space<vmem>>, %arg5: memref<2x128xf32, #tpu.memory_space<vmem>>, %arg6: memref<1x8x256xf32, #tpu.memory_space<vmem>>, %arg7: memref<2x128xf32, #tpu.memory_space<vmem>>, %arg8: memref<2x128xf32, #tpu.memory_space<vmem>>) attributes {dimension_semantics = [#tpu.dimension_semantics<arbitrary>, #tpu.dimension_semantics<arbitrary>, #tpu.dimension_semantics<arbitrary>], iteration_bounds = array<i64: 2, 2, 1>, scalar_prefetch = 0 : i64, scratch_operands = 2 : i64, tpu.core_type = #tpu.core_type<tc>, window_params = [{transform_indices = @transform_0, window_bounds = array<i64: 1, 18, 16, 12>}, {pipeline_mode = #tpu.pipeline_mode<synchronous>, transform_indices = @transform_1, window_bounds = array<i64: 3, 12, 128>}, {pipeline_mode = #tpu.pipeline_mode<synchronous>, transform_indices = @transform_2, window_bounds = array<i64: 2, 128>}, {transform_indices = @transform_3, window_bounds = array<i64: 1, 8, 256>}]} {
    %c16_i32 = arith.constant 16 : i32
    %0 = arith.muli %arg2, %c16_i32 : i32
    %cst = arith.constant 0.000000e+00 : f32
    %1 = vector.broadcast %cst : f32 to vector<256x128xf32>
    %c0_i32 = arith.constant 0 : i32
    %2 = arith.addi %0, %c0_i32 : i32
    %c0 = arith.constant 0 : index
    %3 = arith.index_cast %2 : i32 to index
    %c0_0 = arith.constant 0 : index
    %c0_1 = arith.constant 0 : index
    %4 = vector.load %arg3[%c0, %3, %c0_0, %c0_1] : memref<1x18x16x12xbf16, #tpu.memory_space<vmem>>, vector<1x16x16x12xbf16>
    %5 = vector.shape_cast %4 : vector<1x16x16x12xbf16> to vector<16x16x12xbf16>
    %6 = vector.shape_cast %5 : vector<16x16x12xbf16> to vector<256x12xbf16>
    %c0_2 = arith.constant 0 : index
    %c0_3 = arith.constant 0 : index
    %c0_4 = arith.constant 0 : index
    %7 = vector.load %arg4[%c0_2, %c0_3, %c0_4] : memref<3x12x128xbf16, #tpu.memory_space<vmem>>, vector<1x12x128xbf16>
    %8 = vector.shape_cast %7 : vector<1x12x128xbf16> to vector<12x128xbf16>
    %cst_5 = arith.constant dense<0.000000e+00> : vector<256x128xf32>
    %9 = tpu.matmul %6, %8, %cst_5 {dimension_numbers = #tpu.dot_dimension_numbers<[1], [0], [0], [1], [0, 0, 1, 1], [], []>} : vector<256x12xbf16>, vector<12x128xbf16>, vector<256x128xf32> -> vector<256x128xf32>
    %10 = arith.addf %1, %9 : vector<256x128xf32>
    %c1_i32 = arith.constant 1 : i32
    %11 = arith.addi %0, %c1_i32 : i32
    %c0_6 = arith.constant 0 : index
    %12 = arith.index_cast %11 : i32 to index
    %c0_7 = arith.constant 0 : index
    %c0_8 = arith.constant 0 : index
    %13 = vector.load %arg3[%c0_6, %12, %c0_7, %c0_8] : memref<1x18x16x12xbf16, #tpu.memory_space<vmem>>, vector<1x16x16x12xbf16>
    %14 = vector.shape_cast %13 : vector<1x16x16x12xbf16> to vector<16x16x12xbf16>
    %15 = vector.shape_cast %14 : vector<16x16x12xbf16> to vector<256x12xbf16>
    %c1 = arith.constant 1 : index
    %c0_9 = arith.constant 0 : index
    %c0_10 = arith.constant 0 : index
    %16 = vector.load %arg4[%c1, %c0_9, %c0_10] : memref<3x12x128xbf16, #tpu.memory_space<vmem>>, vector<1x12x128xbf16>
    %17 = vector.shape_cast %16 : vector<1x12x128xbf16> to vector<12x128xbf16>
    %cst_11 = arith.constant dense<0.000000e+00> : vector<256x128xf32>
    %18 = tpu.matmul %15, %17, %cst_11 {dimension_numbers = #tpu.dot_dimension_numbers<[1], [0], [0], [1], [0, 0, 1, 1], [], []>} : vector<256x12xbf16>, vector<12x128xbf16>, vector<256x128xf32> -> vector<256x128xf32>
    %19 = arith.addf %10, %18 : vector<256x128xf32>
    %c2_i32 = arith.constant 2 : i32
    %20 = arith.addi %0, %c2_i32 : i32
    %c0_12 = arith.constant 0 : index
    %21 = arith.index_cast %20 : i32 to index
    %c0_13 = arith.constant 0 : index
    %c0_14 = arith.constant 0 : index
    %22 = vector.load %arg3[%c0_12, %21, %c0_13, %c0_14] : memref<1x18x16x12xbf16, #tpu.memory_space<vmem>>, vector<1x16x16x12xbf16>
    %23 = vector.shape_cast %22 : vector<1x16x16x12xbf16> to vector<16x16x12xbf16>
    %24 = vector.shape_cast %23 : vector<16x16x12xbf16> to vector<256x12xbf16>
    %c2 = arith.constant 2 : index
    %c0_15 = arith.constant 0 : index
    %c0_16 = arith.constant 0 : index
    %25 = vector.load %arg4[%c2, %c0_15, %c0_16] : memref<3x12x128xbf16, #tpu.memory_space<vmem>>, vector<1x12x128xbf16>
    %26 = vector.shape_cast %25 : vector<1x12x128xbf16> to vector<12x128xbf16>
    %cst_17 = arith.constant dense<0.000000e+00> : vector<256x128xf32>
    %27 = tpu.matmul %24, %26, %cst_17 {dimension_numbers = #tpu.dot_dimension_numbers<[1], [0], [0], [1], [0, 0, 1, 1], [], []>} : vector<256x12xbf16>, vector<12x128xbf16>, vector<256x128xf32> -> vector<256x128xf32>
    %28 = arith.addf %19, %27 : vector<256x128xf32>
    %c0_i32_18 = arith.constant 0 : i32
    %29 = arith.cmpi eq, %arg0, %c0_i32_18 : i32
    %c0_i32_19 = arith.constant 0 : i32
    %30 = arith.cmpi eq, %arg1, %c0_i32_19 : i32
    %31 = arith.andi %29, %30 : i1
    %c0_i32_20 = arith.constant 0 : i32
    %32 = arith.cmpi eq, %arg2, %c0_i32_20 : i32
    %33 = arith.andi %31, %32 : i1
    %34 = arith.extui %33 : i1 to i32
    %c0_i32_21 = arith.constant 0 : i32
    %35 = arith.cmpi ne, %34, %c0_i32_21 : i32
    scf.if %35 {
      %cst_30 = arith.constant 0.000000e+00 : f32
      %49 = vector.broadcast %cst_30 : f32 to vector<2x128xf32>
      %c0_31 = arith.constant 0 : index
      %c0_32 = arith.constant 0 : index
      %50 = vector.load %arg7[%c0_31, %c0_32] : memref<2x128xf32, #tpu.memory_space<vmem>>, vector<2x128xf32>
      tpu.vector_store %arg7[%c0_31, %c0_32], %49 {strides = array<i32>} : memref<2x128xf32, #tpu.memory_space<vmem>>, vector<2x128xf32>,
    } else {
    }
    %c0_i32_22 = arith.constant 0 : i32
    %36 = arith.cmpi eq, %arg0, %c0_i32_22 : i32
    %37 = arith.extui %36 : i1 to i32
    %c0_i32_23 = arith.constant 0 : i32
    %38 = arith.cmpi ne, %37, %c0_i32_23 : i32
    scf.if %38 {
      %cst_30 = arith.constant dense<0.000000e+00> : vector<128xf32>
      %49 = vector.multi_reduction <add>, %28, %cst_30 [0] : vector<256x128xf32> to vector<128xf32>
      %50 = vector.shape_cast %49 : vector<128xf32> to vector<1x128xf32>
      %51 = arith.mulf %28, %28 : vector<256x128xf32>
      %cst_31 = arith.constant dense<0.000000e+00> : vector<128xf32>
      %52 = vector.multi_reduction <add>, %51, %cst_31 [0] : vector<256x128xf32> to vector<128xf32>
      %53 = vector.shape_cast %52 : vector<128xf32> to vector<1x128xf32>
      %c0_32 = arith.constant 0 : index
      %c0_33 = arith.constant 0 : index
      %54 = vector.load %arg7[%c0_32, %c0_33] : memref<2x128xf32, #tpu.memory_space<vmem>>, vector<2x128xf32>
      %55 = tpu.concatenate %50, %53 in 0 : vector<1x128xf32>, vector<1x128xf32> -> vector<2x128xf32>
      %56 = arith.addf %54, %55 : vector<2x128xf32>
      %c0_34 = arith.constant 0 : index
      %c0_35 = arith.constant 0 : index
      %57 = vector.load %arg7[%c0_34, %c0_35] : memref<2x128xf32, #tpu.memory_space<vmem>>, vector<2x128xf32>
      tpu.vector_store %arg7[%c0_34, %c0_35], %56 {strides = array<i32>} : memref<2x128xf32, #tpu.memory_space<vmem>>, vector<2x128xf32>,
    } else {
    }
    %c1_i32_24 = arith.constant 1 : i32
    %39 = arith.cmpi eq, %arg0, %c1_i32_24 : i32
    %c0_i32_25 = arith.constant 0 : i32
    %40 = arith.cmpi eq, %arg1, %c0_i32_25 : i32
    %41 = arith.andi %39, %40 : i1
    %c0_i32_26 = arith.constant 0 : i32
    %42 = arith.cmpi eq, %arg2, %c0_i32_26 : i32
    %43 = arith.andi %41, %42 : i1
    %44 = arith.extui %43 : i1 to i32
    %c0_i32_27 = arith.constant 0 : i32
    %45 = arith.cmpi ne, %44, %c0_i32_27 : i32
    scf.if %45 {
      %c0_30 = arith.constant 0 : index
      %c0_31 = arith.constant 0 : index
      %49 = vector.load %arg7[%c0_30, %c0_31] : memref<2x128xf32, #tpu.memory_space<vmem>>, vector<1x128xf32>
      %cst_32 = arith.constant 0.001953125 : f32
      %50 = vector.broadcast %cst_32 : f32 to vector<1x128xf32>
      %51 = arith.mulf %49, %50 : vector<1x128xf32>
      %c1_33 = arith.constant 1 : index
      %c0_34 = arith.constant 0 : index
      %52 = vector.load %arg7[%c1_33, %c0_34] : memref<2x128xf32, #tpu.memory_space<vmem>>, vector<1x128xf32>
      %cst_35 = arith.constant 0.001953125 : f32
      %53 = vector.broadcast %cst_35 : f32 to vector<1x128xf32>
      %54 = arith.mulf %52, %53 : vector<1x128xf32>
      %55 = arith.mulf %51, %51 : vector<1x128xf32>
      %56 = arith.subf %54, %55 : vector<1x128xf32>
      %cst_36 = arith.constant 0.000000e+00 : f32
      %57 = vector.broadcast %cst_36 : f32 to vector<1x128xf32>
      %58 = arith.maximumf %56, %57 : vector<1x128xf32>
      %cst_37 = arith.constant 1.000000e-03 : f32
      %59 = vector.broadcast %cst_37 : f32 to vector<1x128xf32>
      %60 = arith.addf %58, %59 : vector<1x128xf32>
      %61 = math.rsqrt %60 : vector<1x128xf32>
      %c0_38 = arith.constant 0 : index
      %c0_39 = arith.constant 0 : index
      %62 = vector.load %arg5[%c0_38, %c0_39] : memref<2x128xf32, #tpu.memory_space<vmem>>, vector<1x128xf32>
      %63 = arith.mulf %62, %61 : vector<1x128xf32>
      %c1_40 = arith.constant 1 : index
      %c0_41 = arith.constant 0 : index
      %64 = vector.load %arg5[%c1_40, %c0_41] : memref<2x128xf32, #tpu.memory_space<vmem>>, vector<1x128xf32>
      %65 = arith.mulf %51, %63 : vector<1x128xf32>
      %66 = arith.subf %64, %65 : vector<1x128xf32>
      %67 = tpu.concatenate %63, %66 in 0 : vector<1x128xf32>, vector<1x128xf32> -> vector<2x128xf32>
      %c0_42 = arith.constant 0 : index
      %c0_43 = arith.constant 0 : index
      %68 = vector.load %arg8[%c0_42, %c0_43] : memref<2x128xf32, #tpu.memory_space<vmem>>, vector<2x128xf32>
      tpu.vector_store %arg8[%c0_42, %c0_43], %67 {strides = array<i32>} : memref<2x128xf32, #tpu.memory_space<vmem>>, vector<2x128xf32>,
    } else {
    }
    %c1_i32_28 = arith.constant 1 : i32
    %46 = arith.cmpi eq, %arg0, %c1_i32_28 : i32
    %47 = arith.extui %46 : i1 to i32
    %c0_i32_29 = arith.constant 0 : i32
    %48 = arith.cmpi ne, %47, %c0_i32_29 : i32
    scf.if %48 {
      %c0_30 = arith.constant 0 : index
      %c0_31 = arith.constant 0 : index
      %49 = vector.load %arg8[%c0_30, %c0_31] : memref<2x128xf32, #tpu.memory_space<vmem>>, vector<1x128xf32>
      %50 = vector.broadcast %49 : vector<1x128xf32> to vector<256x128xf32>
      %51 = arith.mulf %28, %50 : vector<256x128xf32>
      %c1_32 = arith.constant 1 : index
      %c0_33 = arith.constant 0 : index
      %52 = vector.load %arg8[%c1_32, %c0_33] : memref<2x128xf32, #tpu.memory_space<vmem>>, vector<1x128xf32>
      %53 = vector.broadcast %52 : vector<1x128xf32> to vector<256x128xf32>
      %54 = arith.addf %51, %53 : vector<256x128xf32>
      %55 = tpu.transpose %54, [1, 0] : vector<256x128xf32> -> vector<128x256xf32>
      %56 = vector.extract_strided_slice %55 {offsets = [0, 0], sizes = [8, 256], strides = [1, 1]} : vector<128x256xf32> to vector<8x256xf32>
      %c0_34 = arith.constant 0 : index
      %c0_35 = arith.constant 0 : index
      %c0_36 = arith.constant 0 : index
      %57 = vector.load %arg6[%c0_34, %c0_35, %c0_36] : memref<1x8x256xf32, #tpu.memory_space<vmem>>, vector<1x8x256xf32>
      %58 = vector.shape_cast %57 : vector<1x8x256xf32> to vector<8x256xf32>
      %59 = vector.shape_cast %56 : vector<8x256xf32> to vector<1x8x256xf32>
      tpu.vector_store %arg6[%c0_34, %c0_35, %c0_36], %59 {strides = array<i32>} : memref<1x8x256xf32, #tpu.memory_space<vmem>>, vector<1x8x256xf32>,
    } else {
    }
    return
  }
  func.func @transform_0(%arg0: i32, %arg1: i32, %arg2: i32) -> (i32, i32, i32, i32) {
    %c0_i32 = arith.constant 0 : i32
    %c0_i32_0 = arith.constant 0 : i32
    %c0_i32_1 = arith.constant 0 : i32
    %c0_i32_2 = arith.constant 0 : i32
    return %arg1, %c0_i32, %c0_i32_0, %c0_i32_1 : i32, i32, i32, i32
  }
  func.func @transform_1(%arg0: i32, %arg1: i32, %arg2: i32) -> (i32, i32, i32) {
    %c0_i32 = arith.constant 0 : i32
    %c0_i32_0 = arith.constant 0 : i32
    %c0_i32_1 = arith.constant 0 : i32
    %c0_i32_2 = arith.constant 0 : i32
    return %c0_i32, %c0_i32_0, %c0_i32_1 : i32, i32, i32
  }
  func.func @transform_2(%arg0: i32, %arg1: i32, %arg2: i32) -> (i32, i32) {
    %c0_i32 = arith.constant 0 : i32
    %c0_i32_0 = arith.constant 0 : i32
    %c0_i32_1 = arith.constant 0 : i32
    return %c0_i32, %c0_i32_0 : i32, i32
  }
  func.func @transform_3(%arg0: i32, %arg1: i32, %arg2: i32) -> (i32, i32, i32) {
    %0 = arith.muli %arg0, %arg1 : i32
    %1 = arith.muli %arg0, %arg2 : i32
    %c0_i32 = arith.constant 0 : i32
    %c0_i32_0 = arith.constant 0 : i32
    return %0, %c0_i32, %1 : i32, i32, i32
  }
}

</mosaic_0001>

<bundles_post_ra>
// kernel: cb_forward.1
= control target key start
LH: loop header
LB: loop body
LE: loop exit
PB: predicated region body
PF: predicated region fallthrough
CT: control target
= control target key end

     0   :  { %s2213_s12 = smov 0   ;;  %s2215_s13 = smov 0   ;;  %s2671_s0 = inlined_call_operand.vmem [shape: bf16[2,18,16,12], index: 0, kind: input, shape index: {}]   ;;  %s2672_s1 = inlined_call_operand.vmem [shape: bf16[3,12,128], index: 1, kind: input, shape index: {}]   ;;  %s2673_s2 = inlined_call_operand.vmem [shape: f32[2,128], index: 2, kind: input, shape index: {}]   ;;  %s2674_s3 = inlined_call_operand.vmem [shape: f32[2,8,256], index: 3, kind: output, shape index: {}]  }
   0x1   :  { %s2217_s14 = smov 0   ;;  %s2219_s15 = smov 0  }
   0x2   :  { %s2221_s16 = smov 0  }
   0x3 LB: > { %s28_s17 = sadd.s32 1, %s2182_s14  ;;  %s32_s18 = sadd.s32 1, %s2186_s15  ;;  %s2190_s16 = sphi %s2221_s16, %s13_s16   ;;  %s2186_s15 = sphi %s2219_s15, %s2679_s15   ;;  %s2182_s14 = sphi %s2217_s14, %s2678_s14   ;;  %s2178_s13 = sphi %s2215_s13, %s2677_s13   ;;  %s2174_s12 = sphi %s2213_s12, %s2676_s12  }
   0x4   : > { %p30_p0 = scmp.ge.s32.totalorder %s28_s17, 2  ;;  %p1654_p1 = scmp.ge.s32.totalorder %s2190_s16, 1 }
   0x5   : > { %p162_p2 = scmp.lt.s32.totalorder %s2190_s16, 5 }
   0x6   : > { %s2681_s17 = smov (%p30_p0, %s28_s17), 0  ;;  %s2683_s18 = smov (!%p30_p0, %s32_s18), %s2186_s15 }
   0x7   : > { %p163_p3 = pnand %p1654_p1, %p162_p2  ;;  %p34_p4 = scmp.ge.s32.totalorder %s2683_s18, 2 }
   0x8   : > { %s197_s19 = smul.u32 (!%p163_p3), %s2174_s12, %s2178_s13  ;;  %v2099_v0 = vld [vmem:[%s2672_s1 + $0x8] sm:$0x3f] (!%p163_p3)   ;;  %vm423_vm0 = vcmask (!%p163_p3), 1045504   ;;  %p192_p5 = scmp.lt.s32.totalorder (!%p163_p3), %s2174_s12, 1  ;;  %v2100_v1 = vld [vmem:[%s2672_s1] sm:$0x3f] (!%p163_p3)  }
   0x9   : > { %s2685_s18 = smov (%p34_p4, %s2683_s18), 0  ;;  %166 = sbr.rel (%p163_p3) target bundleno = 587 (0x24b), region = 32 }
   0xa   : > { %p200_p6 = scmp.lt.s32.totalorder (!%p163_p3), %s197_s19, 1  ;;  %2053 = vmatprep.subr.msk.bf16.mxu1 (!%p163_p3), %vm423_vm0, %v2099_v0  ;;  %v425_v2 = vsel (!%p163_p3), %vm423_vm0, %v2099_v0, 0  ;;  %2054 = vmatprep.subr.msk.bf16.mxu0 (!%p163_p3), %vm423_vm0, %v2100_v1  ;;  %v722_v3 = vsel (!%p163_p3), %vm423_vm0, %v2100_v1, 0  ;;  %v2103_v4 = vld [vmem:[%s2672_s1 + $0x10] sm:$0x3f] (!%p163_p3)   ;;  %vm374_vm1 = vcmask (!%p163_p3), 97280  }
   0xb   : > { %1886 = vmatpush3.bf16.msra.mxu1 (!%p163_p3), %v425_v2  ;;  %1920 = vmatpush3.bf16.msra.mxu0 (!%p163_p3), %v722_v3  ;;  %v1058_v9 = vsel (!%p163_p3), %vm423_vm0, %v2103_v4, 0  ;;  %p1253_p7 = scmp.eq.s32.totalorder (!%p163_p3), %s2178_s13, 0  ;;  %p1254_p8 = scmp.eq.s32.totalorder (!%p163_p3), %s2174_s12, 0 }
   0xc   : > { %2055 = vmatprep.subr.msk.bf16.mxu1 (!%p163_p3), %vm423_vm0, %v2100_v1  ;;  %2056 = vmatprep.subr.msk.bf16.mxu0 (!%p163_p3), %vm423_vm0, %v2103_v4 }
   0xd   : > { %p2377_p9 = pnand (!%p163_p3), %p1254_p8, %p1253_p7 }
  0x10   : > { %s193_s24 = scalar_select %p192_p5, %s2174_s12, 1 }
  0x11   : > { %s2687_s19 = smov (!%p200_p6, %s197_s19), 1 }
  0x12   : > { %s2057_s27 = smul.u32 144, %s193_s24  ;;  %s1833_s28 = sshll.u32 %s2687_s19, 4 }
  0x13   : > { %s2269_s4 = scalar_lea.vmem %s2674_s3, %s1833_s28 }
  0x14   : > { %s2274_s7 = scalar_lea.vmem %s2671_s0, %s2057_s27 }
  0x15   : > { %v2101_v5 = vld [vmem:[%s2274_s7 + $0x8] sm:$0xff]   ;;  %v2102_v6 = vld [vmem:[%s2274_s7] sm:$0xff]   ;;  %v2104_v7 = vld [vmem:[%s2274_s7 + $0x10] sm:$0xff]  }
  0x16   : > { %1887 = vmatprep.mubr.msk.bf16.mxu1 %vm374_vm1, %v2101_v5  ;;  %1921 = vmatprep.mubr.msk.bf16.mxu0 %vm374_vm1, %v2102_v6  ;;  %v2105_v8 = vld [vmem:[%s2274_s7 + $0x8] sm:$0xff]   ;;  %v2106_v10 = vld [vmem:[%s2274_s7 + $0x18] sm:$0xff]   ;;  %v2107_v11 = vld [vmem:[%s2274_s7 + $0x10] sm:$0xff]  }
  0x17   : > { %1888 = vmatmul.mubr.msk.bf16.vlgmr.msra.gmra.mrb[0].mxu1 %vm374_vm1, %v2104_v7  ;;  %1922 = vmatmul.mubr.msk.bf16.vlgmr.msra.gmra.mrb[0].mxu0 %vm374_vm1, %v2105_v8  ;;  %v2108_v12 = vld [vmem:[%s2274_s7 + $0x20] sm:$0xff]   ;;  %v2109_v13 = vld [vmem:[%s2274_s7 + $0x18] sm:$0xff]   ;;  %v2110_v14 = vld [vmem:[%s2274_s7 + $0x28] sm:$0xff]  }
  0x18   : > { %1988 = vmatpush3.bf16.msra.mxu1 %v722_v3  ;;  %1954 = vmatpush3.bf16.msra.mxu0 %v1058_v9  ;;  %v2111_v15 = vld [vmem:[%s2274_s7 + $0x20] sm:$0xff]   ;;  %v2112_v16 = vld [vmem:[%s2274_s7 + $0x30] sm:$0xff]   ;;  %v2113_v17 = vld [vmem:[%s2274_s7 + $0x28] sm:$0xff]  }
  0x19   : > { %1891 = vmatprep.mubr.msk.bf16.mxu1 %vm374_vm1, %v2106_v10  ;;  %1925 = vmatprep.mubr.msk.bf16.mxu0 %vm374_vm1, %v2107_v11  ;;  %v2114_v18 = vld [vmem:[%s2274_s7 + $0x38] sm:$0xff]   ;;  %v2115_v19 = vld [vmem:[%s2274_s7 + $0x30] sm:$0xff]   ;;  %v2116_v20 = vld [vmem:[%s2274_s7 + $0x40] sm:$0xff]  }
  0x1a   : > { %v2117_v21 = vld [vmem:[%s2274_s7 + $0x38] sm:$0xff]   ;;  %v2118_v22 = vld [vmem:[%s2274_s7 + $0x48] sm:$0xff]   ;;  %v2119_v23 = vld [vmem:[%s2274_s7 + $0x10] sm:$0xff]  }
  0x1b   : > { %v2120_v24 = vld [vmem:[%s2274_s7 + $0x50] sm:$0xff]   ;;  %v2121_v25 = vld [vmem:[%s2274_s7 + $0x18] sm:$0xff]   ;;  %v2123_v27 = vld [vmem:[%s2274_s7 + $0x20] sm:$0xff]  }
  0x1c   : > { %v2122_v26 = vld [vmem:[%s2274_s7 + $0x58] sm:$0xff]   ;;  %v2124_v28 = vld [vmem:[%s2274_s7 + $0x60] sm:$0xff]   ;;  %v2125_v29 = vld [vmem:[%s2274_s7 + $0x28] sm:$0xff]  }
  0x1d   : > { %v2126_v30 = vld [vmem:[%s2274_s7 + $0x68] sm:$0xff]   ;;  %v2127_v31 = vld [vmem:[%s2274_s7 + $0x30] sm:$0xff]   ;;  %v2129_v33 = vld [vmem:[%s2274_s7 + $0x38] sm:$0xff]  }
  0x1e   : > { %v2128_v32 = vld [vmem:[%s2274_s7 + $0x70] sm:$0xff]   ;;  %v2130_v34 = vld [vmem:[%s2274_s7 + $0x78] sm:$0xff]   ;;  %v2131_v35 = vld [vmem:[%s2274_s7 + $0x40] sm:$0xff]  }
  0x1f   : > { %1892 = vmatmul.mubr.msk.bf16.gmra.mrb[4].mxu1 %vm374_vm1, %v2108_v12  ;;  %1926 = vmatmul.mubr.msk.bf16.gmra.mrb[4].mxu0 %vm374_vm1, %v2109_v13  ;;  %v2132_v36 = vld [vmem:[%s2274_s7 + $0x80] sm:$0xff]   ;;  %v2133_v37 = vld [vmem:[%s2274_s7 + $0x48] sm:$0xff]   ;;  %v2135_v39 = vld [vmem:[%s2274_s7 + $0x50] sm:$0xff]  }
  0x20   : > { %1895 = vmatprep.mubr.msk.bf16.mxu1 %vm374_vm1, %v2110_v14  ;;  %1929 = vmatprep.mubr.msk.bf16.mxu0 %vm374_vm1, %v2111_v15  ;;  %v2134_v38 = vld [vmem:[%s2274_s7 + $0x40] sm:$0xff]   ;;  %v2136_v40 = vld [vmem:[%s2274_s7 + $0x48] sm:$0xff]   ;;  %v2137_v41 = vld [vmem:[%s2274_s7 + $0x58] sm:$0xff]  }
  0x21   : > { %v2138_v42 = vld [vmem:[%s2274_s7 + $0x50] sm:$0xff]   ;;  %v2139_v43 = vld [vmem:[%s2274_s7 + $0x60] sm:$0xff]   ;;  %v2140_v44 = vld [vmem:[%s2274_s7 + $0x58] sm:$0xff]  }
  0x22   : > { %v2141_v45 = vld [vmem:[%s2274_s7 + $0x68] sm:$0xff]   ;;  %v2142_v46 = vld [vmem:[%s2274_s7 + $0x60] sm:$0xff]   ;;  %v2143_v47 = vld [vmem:[%s2274_s7 + $0x70] sm:$0xff]  }
  0x23   : > { %v2144_v48 = vld [vmem:[%s2274_s7 + $0x68] sm:$0xff]   ;;  %v2145_v49 = vld [vmem:[%s2274_s7 + $0x78] sm:$0xff]   ;;  %v2146_v50 = vld [vmem:[%s2274_s7 + $0x70] sm:$0xff]  }
  0x24   : > { %v2147_v51 = vld [vmem:[%s2274_s7 + $0x80] sm:$0xff]   ;;  %v2148_v52 = vld [vmem:[%s2274_s7 + $0x78] sm:$0xff]   ;;  %v2149_v53 = vld [vmem:[%s2274_s7 + $0x88] sm:$0xff]  }
  0x27   : > { %1896 = vmatmul.mubr.msk.bf16.gmra.mrb[8].mxu1 %vm374_vm1, %v2112_v16  ;;  %1930 = vmatmul.mubr.msk.bf16.gmra.mrb[8].mxu0 %vm374_vm1, %v2113_v17 }
  0x28   : > { %1899 = vmatprep.mubr.msk.bf16.mxu1 %vm374_vm1, %v2114_v18  ;;  %1933 = vmatprep.mubr.msk.bf16.mxu0 %vm374_vm1, %v2115_v19 }
  0x2f   : > { %1900 = vmatmul.mubr.msk.bf16.gmra.mrb[12].mxu1 %vm374_vm1, %v2116_v20  ;;  %1934 = vmatmul.mubr.msk.bf16.gmra.mrb[12].mxu0 %vm374_vm1, %v2117_v21 }
  0x30   : > { %1903 = vmatprep.mubr.msk.bf16.mxu1 %vm374_vm1, %v2118_v22  ;;  %1955 = vmatprep.mubr.msk.bf16.mxu0 %vm374_vm1, %v2119_v23 }
  0x37   : > { %1904 = vmatmul.mubr.msk.bf16.gmra.mrb[16].mxu1 %vm374_vm1, %v2120_v24  ;;  %1956 = vmatmul.mubr.msk.bf16.vlgmr.msra.gmra.mrb[0].mxu0 %vm374_vm1, %v2121_v25 }
  0x38   : > { %1907 = vmatprep.mubr.msk.bf16.mxu1 %vm374_vm1, %v2122_v26  ;;  %1959 = vmatprep.mubr.msk.bf16.mxu0 %vm374_vm1, %v2123_v27 }
  0x3f   : > { %1908 = vmatmul.mubr.msk.bf16.gmra.mrb[20].mxu1 %vm374_vm1, %v2124_v28  ;;  %1960 = vmatmul.mubr.msk.bf16.gmra.mrb[4].mxu0 %vm374_vm1, %v2125_v29 }
  0x40   : > { %1911 = vmatprep.mubr.msk.bf16.mxu1 %vm374_vm1, %v2126_v30  ;;  %1963 = vmatprep.mubr.msk.bf16.mxu0 %vm374_vm1, %v2127_v31 }
  0x47   : > { %1912 = vmatmul.mubr.msk.bf16.gmra.mrb[24].mxu1 %vm374_vm1, %v2128_v32  ;;  %1964 = vmatmul.mubr.msk.bf16.gmra.mrb[8].mxu0 %vm374_vm1, %v2129_v33 }
  0x48   : > { %1915 = vmatprep.mubr.msk.bf16.mxu1 %vm374_vm1, %v2130_v34  ;;  %1967 = vmatprep.mubr.msk.bf16.mxu0 %vm374_vm1, %v2131_v35 }
  0x4f   : > { %1916 = vmatmul.mubr.msk.bf16.gmra.mrb[28].mxu1 %vm374_vm1, %v2132_v36  ;;  %1968 = vmatmul.mubr.msk.bf16.gmra.mrb[12].mxu0 %vm374_vm1, %v2133_v37 }
  0x50   : > { %1937 = vmatprep.mubr.msk.bf16.mxu1 %vm374_vm1, %v2134_v38  ;;  %1971 = vmatprep.mubr.msk.bf16.mxu0 %vm374_vm1, %v2135_v39 }
  0x57   : > { %1938 = vmatmul.mubr.msk.bf16.vlgmr.msra.gmra.mrb[16].mxu1 %vm374_vm1, %v2136_v40  ;;  %1972 = vmatmul.mubr.msk.bf16.gmra.mrb[16].mxu0 %vm374_vm1, %v2137_v41 }
  0x58   : > { %1941 = vmatprep.mubr.msk.bf16.mxu1 %vm374_vm1, %v2138_v42  ;;  %1975 = vmatprep.mubr.msk.bf16.mxu0 %vm374_vm1, %v2139_v43 }
  0x5f   : > { %1942 = vmatmul.mubr.msk.bf16.gmra.mrb[20].mxu1 %vm374_vm1, %v2140_v44  ;;  %1976 = vmatmul.mubr.msk.bf16.gmra.mrb[20].mxu0 %vm374_vm1, %v2141_v45 }
  0x60   : > { %1945 = vmatprep.mubr.msk.bf16.mxu1 %vm374_vm1, %v2142_v46  ;;  %1979 = vmatprep.mubr.msk.bf16.mxu0 %vm374_vm1, %v2143_v47 }
  0x67   : > { %1946 = vmatmul.mubr.msk.bf16.gmra.mrb[24].mxu1 %vm374_vm1, %v2144_v48  ;;  %1980 = vmatmul.mubr.msk.bf16.gmra.mrb[24].mxu0 %vm374_vm1, %v2145_v49 }
  0x68   : > { %1949 = vmatprep.mubr.msk.bf16.mxu1 %vm374_vm1, %v2146_v50  ;;  %1983 = vmatprep.mubr.msk.bf16.mxu0 %vm374_vm1, %v2147_v51 }
  0x6f   : > { %1950 = vmatmul.mubr.msk.bf16.gmra.mrb[28].mxu1 %vm374_vm1, %v2148_v52  ;;  %1984 = vmatmul.mubr.msk.bf16.gmra.mrb[28].mxu0 %vm374_vm1, %v2149_v53 }
  0xea   : > { %v1889_v54 = vpop.f32.mrb[0].mxu1 }
  0xeb   : > { %v461_v55 = vpop.f32.mrb[1].mxu1 }
  0xec   : > { %v1890_v56 = vpop.f32.mrb[2].mxu1 }
  0xed   : > { %v464_v57 = vpop.f32.mrb[3].mxu1 }
  0xf2   : > { %v1893_v58 = vpop.f32.mrb[4].mxu1 }
  0xf3   : > { %v477_v59 = vpop.f32.mrb[5].mxu1 }
  0xf4   : > { %v1894_v60 = vpop.f32.mrb[6].mxu1 }
  0xf5   : > { %v480_v61 = vpop.f32.mrb[7].mxu1 }
  0xfa   : > { %v1897_v62 = vpop.f32.mrb[8].mxu1 }
  0xfb   : > { %v493_v63 = vpop.f32.mrb[9].mxu1 }
  0xfc   : > { %v1898_v0 = vpop.f32.mrb[10].mxu1 }
  0xfd   : > { %v496_v1 = vpop.f32.mrb[11].mxu1 }
 0x102   : > { %v1901_v2 = vpop.f32.mrb[12].mxu1 }
 0x103   : > { %v509_v3 = vpop.f32.mrb[13].mxu1 }
 0x104   : > { %v1902_v4 = vpop.f32.mrb[14].mxu1 }
 0x105   : > { %v512_v5 = vpop.f32.mrb[15].mxu1 }
 0x10a   : > { %v1957_v6 = vpop.f32.mrb[0].mxu0 }
 0x10b   : > { %v2381_v7 = vadd.f32 %v1957_v6, %v1889_v54  ;;  %v1094_v8 = vpop.f32.mrb[1].mxu0 }
 0x10c   : > { %v2383_v9 = vadd.f32 %v1094_v8, %v461_v55  ;;  %v1958_v10 = vpop.f32.mrb[2].mxu0 }
 0x10d   : > { %v2385_v11 = vadd.f32 %v1958_v10, %v1890_v56  ;;  %v1097_v12 = vpop.f32.mrb[3].mxu0 }
 0x10e   : > { %v2387_v13 = vadd.f32 %v1097_v12, %v464_v57 }
 0x112   : > { %v1961_v14 = vpop.f32.mrb[4].mxu0 }
 0x113   : > { %v2389_v15 = vadd.f32 %v1961_v14, %v1893_v58  ;;  %v1110_v16 = vpop.f32.mrb[5].mxu0 }
 0x114   : > { %v2391_v17 = vadd.f32 %v1110_v16, %v477_v59  ;;  %v1962_v18 = vpop.f32.mrb[6].mxu0 }
 0x115   : > { %v2393_v19 = vadd.f32 %v1962_v18, %v1894_v60  ;;  %v1113_v20 = vpop.f32.mrb[7].mxu0 }
 0x116   : > { %v2395_v21 = vadd.f32 %v1113_v20, %v480_v61 }
 0x11a   : > { %v1965_v22 = vpop.f32.mrb[8].mxu0 }
 0x11b   : > { %v2397_v23 = vadd.f32 %v1965_v22, %v1897_v62  ;;  %v1126_v24 = vpop.f32.mrb[9].mxu0 }
 0x11c   : > { %v2399_v25 = vadd.f32 %v1126_v24, %v493_v63  ;;  %v1966_v26 = vpop.f32.mrb[10].mxu0 }
 0x11d   : > { %v2401_v27 = vadd.f32 %v1966_v26, %v1898_v0  ;;  %v1129_v28 = vpop.f32.mrb[11].mxu0 }
 0x11e   : > { %v2403_v29 = vadd.f32 %v1129_v28, %v496_v1 }
 0x122   : > { %v1969_v30 = vpop.f32.mrb[12].mxu0 }
 0x123   : > { %v2405_v31 = vadd.f32 %v1969_v30, %v1901_v2  ;;  %v1142_v32 = vpop.f32.mrb[13].mxu0 }
 0x124   : > { %v2407_v33 = vadd.f32 %v1142_v32, %v509_v3  ;;  %v1970_v34 = vpop.f32.mrb[14].mxu0 }
 0x125   : > { %v2409_v35 = vadd.f32 %v1970_v34, %v1902_v4  ;;  %v1145_v36 = vpop.f32.mrb[15].mxu0 }
 0x126   : > { %v2411_v37 = vadd.f32 %v1145_v36, %v512_v5 }
 0x12a   : > { %v1939_v38 = vpop.f32.mrb[16].mxu1  ;;  %v1973_v39 = vpop.f32.mrb[16].mxu0 }
 0x12b   : > { %v822_v40 = vpop.f32.mrb[17].mxu1  ;;  %v2413_v41 = vadd.f32 %v1973_v39, %v1939_v38  ;;  %v1158_v42 = vpop.f32.mrb[17].mxu0  ;;  %v2192_v38 = vmov (!%p2377_p9), 0.0  }
 0x12c   : > { %v1940_v43 = vpop.f32.mrb[18].mxu1  ;;  %v2415_v44 = vadd.f32 %v1158_v42, %v822_v40  ;;  %v1974_v45 = vpop.f32.mrb[18].mxu0  ;;  %1262 = vst [vmem:[#allocation2] sm:$0x3] (!%p2377_p9), %v2192_v38 }
 0x12d   : > { %v825_v46 = vpop.f32.mrb[19].mxu1  ;;  %v2417_v47 = vadd.f32 %v1974_v45, %v1940_v43  ;;  %v1161_v48 = vpop.f32.mrb[19].mxu0 }
 0x12e   : > { %v2419_v49 = vadd.f32 %v1161_v48, %v825_v46 }
 0x132   : > { %v1943_v50 = vpop.f32.mrb[20].mxu1  ;;  %v1977_v51 = vpop.f32.mrb[20].mxu0 }
 0x133   : > { %v838_v52 = vpop.f32.mrb[21].mxu1  ;;  %v2421_v53 = vadd.f32 %v1977_v51, %v1943_v50  ;;  %v1174_v54 = vpop.f32.mrb[21].mxu0 }
 0x134   : > { %v1944_v55 = vpop.f32.mrb[22].mxu1  ;;  %v2423_v56 = vadd.f32 %v1174_v54, %v838_v52  ;;  %v1978_v57 = vpop.f32.mrb[22].mxu0 }
 0x135   : > { %v841_v58 = vpop.f32.mrb[23].mxu1  ;;  %v2425_v59 = vadd.f32 %v1978_v57, %v1944_v55  ;;  %v1177_v60 = vpop.f32.mrb[23].mxu0 }
 0x136   : > { %v2427_v61 = vadd.f32 %v1177_v60, %v841_v58 }
 0x13a   : > { %v1947_v62 = vpop.f32.mrb[24].mxu1  ;;  %v1981_v63 = vpop.f32.mrb[24].mxu0 }
 0x13b   : > { %v854_v0 = vpop.f32.mrb[25].mxu1  ;;  %v2429_v1 = vadd.f32 %v1981_v63, %v1947_v62  ;;  %v1190_v2 = vpop.f32.mrb[25].mxu0 }
 0x13c   : > { %v1948_v3 = vpop.f32.mrb[26].mxu1  ;;  %v2431_v4 = vadd.f32 %v1190_v2, %v854_v0  ;;  %v1982_v5 = vpop.f32.mrb[26].mxu0 }
 0x13d   : > { %v857_v6 = vpop.f32.mrb[27].mxu1  ;;  %v2433_v8 = vadd.f32 %v1982_v5, %v1948_v3  ;;  %v1193_v10 = vpop.f32.mrb[27].mxu0 }
 0x13e   : > { %v2435_v12 = vadd.f32 %v1193_v10, %v857_v6 }
 0x140   : > { %1261 = sbr.rel (%p2377_p9) target bundleno = 327 (0x147), region = 36 }
 0x142   : > { %v1951_v14 = vpop.f32.mrb[28].mxu1  ;;  %v1985_v16 = vpop.f32.mrb[28].mxu0 }
 0x143   : > { %v870_v18 = vpop.f32.mrb[29].mxu1  ;;  %v2437_v20 = vadd.f32 %v1985_v16, %v1951_v14  ;;  %v1206_v22 = vpop.f32.mrb[29].mxu0 }
 0x144   : > { %v1952_v24 = vpop.f32.mrb[30].mxu1  ;;  %v2439_v26 = vadd.f32 %v1206_v22, %v870_v18  ;;  %v1986_v28 = vpop.f32.mrb[30].mxu0 }
 0x145   : > { %v873_v30 = vpop.f32.mrb[31].mxu1  ;;  %v2441_v32 = vadd.f32 %v1986_v28, %v1952_v24  ;;  %v1209_v34 = vpop.f32.mrb[31].mxu0 }
 0x146   : > { %v2443_v36 = vadd.f32 %v1209_v34, %v873_v30 }
 0x147 PF: > { %p1826_p10 = scmp.ne.s32.totalorder %s2178_s13, 0 }
 0x148   : > { %v1266_v39 = vadd.f32 (!%p1826_p10), %v2387_v13, %v2383_v9  ;;  %v1303_v43 = vmul.f32 (!%p1826_p10), %v2383_v9, %v2383_v9  ;;  %v1304_v45 = vmul.f32 (!%p1826_p10), %v2387_v13, %v2387_v13  ;;  %v1305_v48 = vmul.f32 (!%p1826_p10), %v2381_v7, %v2381_v7 }
 0x149   : > { %1265 = sbr.rel (%p1826_p10) target bundleno = 408 (0x198), region = 40  ;;  %v1306_v51 = vmul.f32 (!%p1826_p10), %v2385_v11, %v2385_v11  ;;  %v1307_v55 = vmul.f32 (!%p1826_p10), %v2391_v17, %v2391_v17  ;;  %v1308_v60 = vmul.f32 (!%p1826_p10), %v2395_v21, %v2395_v21  ;;  %v1309_v0 = vmul.f32 (!%p1826_p10), %v2389_v15, %v2389_v15 }
 0x14a   : > { %v1267_v40 = vadd.f32 (!%p1826_p10), %v2381_v7, %v1266_v39  ;;  %v1335_v52 = vadd.f32 (!%p1826_p10), %v1304_v45, %v1303_v43  ;;  %v1310_v5 = vmul.f32 (!%p1826_p10), %v2393_v19, %v2393_v19  ;;  %v1311_v14 = vmul.f32 (!%p1826_p10), %v2399_v25, %v2399_v25 }
 0x14b   : > { %v1312_v22 = vmul.f32 (!%p1826_p10), %v2403_v29, %v2403_v29  ;;  %v1313_v30 = vmul.f32 (!%p1826_p10), %v2397_v23, %v2397_v23  ;;  %v1314_v39 = vmul.f32 (!%p1826_p10), %v2401_v27, %v2401_v27  ;;  %v1315_v43 = vmul.f32 (!%p1826_p10), %v2407_v33, %v2407_v33 }
 0x14c   : > { %v1268_v42 = vadd.f32 (!%p1826_p10), %v2385_v11, %v1267_v40  ;;  %v1336_v57 = vadd.f32 (!%p1826_p10), %v1335_v52, %v1305_v48  ;;  %v1316_v48 = vmul.f32 (!%p1826_p10), %v2411_v37, %v2411_v37  ;;  %v1317_v52 = vmul.f32 (!%p1826_p10), %v2405_v31, %v2405_v31 }
 0x14d   : > { %vm1373_vm2 = vcmask (!%p1826_p10), 1040384  }
 0x14e   : > { %v1269_v46 = vadd.f32 (!%p1826_p10), %v2391_v17, %v1268_v42  ;;  %v1337_v62 = vadd.f32 (!%p1826_p10), %v1336_v57, %v1306_v51  ;;  %v1318_v57 = vmul.f32 (!%p1826_p10), %v2409_v35, %v2409_v35 }
 0x150   : > { %v1270_v50 = vadd.f32 %v2395_v21, %v1269_v46  ;;  %v1338_v2 = vadd.f32 %v1337_v62, %v1307_v55  ;;  %v1319_v62 = vmul.f32 %v2415_v44, %v2415_v44 }
 0x152   : > { %v1271_v54 = vadd.f32 %v2389_v15, %v1270_v50  ;;  %v1339_v6 = vadd.f32 %v1338_v2, %v1308_v60  ;;  %v1320_v2 = vmul.f32 %v2419_v49, %v2419_v49 }
 0x154   : > { %v1272_v58 = vadd.f32 %v2393_v19, %v1271_v54  ;;  %v1340_v16 = vadd.f32 %v1339_v6, %v1309_v0  ;;  %v1321_v6 = vmul.f32 %v2413_v41, %v2413_v41 }
 0x156   : > { %v1273_v63 = vadd.f32 %v2399_v25, %v1272_v58  ;;  %v1341_v24 = vadd.f32 %v1340_v16, %v1310_v5  ;;  %v1322_v16 = vmul.f32 %v2417_v47, %v2417_v47 }
 0x158   : > { %v1274_v3 = vadd.f32 %v2403_v29, %v1273_v63  ;;  %v1342_v34 = vadd.f32 %v1341_v24, %v1311_v14  ;;  %v1323_v24 = vmul.f32 %v2423_v56, %v2423_v56 }
 0x15a   : > { %v1275_v10 = vadd.f32 %v2397_v23, %v1274_v3  ;;  %v1343_v40 = vadd.f32 %v1342_v34, %v1312_v22  ;;  %v1324_v34 = vmul.f32 %v2427_v61, %v2427_v61 }
 0x15c   : > { %v1276_v18 = vadd.f32 %v2401_v27, %v1275_v10  ;;  %v1344_v45 = vadd.f32 %v1343_v40, %v1313_v30  ;;  %v1325_v40 = vmul.f32 %v2421_v53, %v2421_v53 }
 0x15e   : > { %v1277_v28 = vadd.f32 %v2407_v33, %v1276_v18  ;;  %v1345_v50 = vadd.f32 %v1344_v45, %v1314_v39  ;;  %v1326_v45 = vmul.f32 %v2425_v59, %v2425_v59 }
 0x160   : > { %v1278_v38 = vadd.f32 %v2411_v37, %v1277_v28  ;;  %v1346_v54 = vadd.f32 %v1345_v50, %v1315_v43  ;;  %v1327_v50 = vmul.f32 %v2431_v4, %v2431_v4 }
 0x162   : > { %v1279_v42 = vadd.f32 %v2405_v31, %v1278_v38  ;;  %v1347_v58 = vadd.f32 %v1346_v54, %v1316_v48  ;;  %v1328_v54 = vmul.f32 %v2435_v12, %v2435_v12 }
 0x164   : > { %v1280_v46 = vadd.f32 %v2409_v35, %v1279_v42  ;;  %v1348_v63 = vadd.f32 %v1347_v58, %v1317_v52  ;;  %v1329_v58 = vmul.f32 %v2429_v1, %v2429_v1 }
 0x166   : > { %v1281_v51 = vadd.f32 %v2415_v44, %v1280_v46  ;;  %v1349_v3 = vadd.f32 %v1348_v63, %v1318_v57  ;;  %v1330_v63 = vmul.f32 %v2433_v8, %v2433_v8 }
 0x168   : > { %v1282_v55 = vadd.f32 %v2419_v49, %v1281_v51  ;;  %v1350_v10 = vadd.f32 %v1349_v3, %v1319_v62  ;;  %v1331_v3 = vmul.f32 %v2439_v26, %v2439_v26 }
 0x16a   : > { %v1283_v60 = vadd.f32 %v2413_v41, %v1282_v55  ;;  %v1351_v18 = vadd.f32 %v1350_v10, %v1320_v2  ;;  %v1332_v10 = vmul.f32 %v2443_v36, %v2443_v36 }
 0x16c   : > { %v1284_v0 = vadd.f32 %v2417_v47, %v1283_v60  ;;  %v1352_v28 = vadd.f32 %v1351_v18, %v1321_v6  ;;  %v1333_v18 = vmul.f32 %v2437_v20, %v2437_v20 }
 0x16e   : > { %v1285_v5 = vadd.f32 %v2423_v56, %v1284_v0  ;;  %v1353_v38 = vadd.f32 %v1352_v28, %v1322_v16  ;;  %v1334_v28 = vmul.f32 %v2441_v32, %v2441_v32 }
 0x170   : > { %v1286_v14 = vadd.f32 %v2427_v61, %v1285_v5  ;;  %v1354_v42 = vadd.f32 %v1353_v38, %v1323_v24 }
 0x172   : > { %v1287_v22 = vadd.f32 %v2421_v53, %v1286_v14  ;;  %v1355_v46 = vadd.f32 %v1354_v42, %v1324_v34 }
 0x174   : > { %v1288_v30 = vadd.f32 %v2425_v59, %v1287_v22  ;;  %v1356_v51 = vadd.f32 %v1355_v46, %v1325_v40 }
 0x176   : > { %v1289_v39 = vadd.f32 %v2431_v4, %v1288_v30  ;;  %v1357_v55 = vadd.f32 %v1356_v51, %v1326_v45 }
 0x178   : > { %v1290_v43 = vadd.f32 %v2435_v12, %v1289_v39  ;;  %v1358_v60 = vadd.f32 %v1357_v55, %v1327_v50 }
 0x17a   : > { %v1291_v48 = vadd.f32 %v2429_v1, %v1290_v43  ;;  %v1359_v0 = vadd.f32 %v1358_v60, %v1328_v54  ;;  %v1372_v54 = vld [vmem:[#allocation2] sm:$0x3] }
 0x17c   : > { %v1292_v52 = vadd.f32 %v2433_v8, %v1291_v48  ;;  %v1360_v5 = vadd.f32 %v1359_v0, %v1329_v58 }
 0x17e   : > { %v1293_v57 = vadd.f32 %v2439_v26, %v1292_v52  ;;  %v1361_v14 = vadd.f32 %v1360_v5, %v1330_v63 }
 0x180   : > { %v1294_v62 = vadd.f32 %v2443_v36, %v1293_v57  ;;  %v1362_v22 = vadd.f32 %v1361_v14, %v1331_v3 }
 0x182   : > { %v1295_v2 = vadd.f32 %v2437_v20, %v1294_v62  ;;  %v1363_v30 = vadd.f32 %v1362_v22, %v1332_v10 }
 0x184   : > { %v1296_v6 = vadd.f32 %v2441_v32, %v1295_v2  ;;  %v1364_v38 = vadd.f32 %v1363_v30, %v1333_v18 }
 0x186   : > { %v1297_v16 = vrot.slane %v1296_v6, 4  ;;  %v1365_v39 = vadd.f32 %v1364_v38, %v1334_v28 }
 0x188   : > { %v1298_v24 = vadd.f32 %v1297_v16, %v1296_v6  ;;  %v1366_v42 = vrot.slane %v1365_v39, 4 }
 0x18a   : > { %v1299_v34 = vrot.slane %v1298_v24, 2  ;;  %v1367_v43 = vadd.f32 %v1366_v42, %v1365_v39 }
 0x18c   : > { %v1300_v40 = vadd.f32 %v1299_v34, %v1298_v24  ;;  %v1368_v46 = vrot.slane %v1367_v43, 2 }
 0x18e   : > { %v1301_v45 = vrot.slane %v1300_v40, 1  ;;  %v1369_v48 = vadd.f32 %v1368_v46, %v1367_v43 }
 0x190   : > { %v1302_v50 = vadd.f32 %v1301_v45, %v1300_v40  ;;  %v1370_v51 = vrot.slane %v1369_v48, 1 }
 0x192   : > { %v1371_v52 = vadd.f32 %v1370_v51, %v1369_v48 }
 0x194   : > { %v1374_v55 = vsel %vm1373_vm2, %v1302_v50, %v1371_v52 }
 0x195   : > { %v1375_v57 = vadd.f32 %v1374_v55, %v1372_v54 }
 0x197   : > { %1376 = vst [vmem:[#allocation2] sm:$0x3] %v1375_v57 }
 0x198 PF: > { %p1377_p11 = scmp.eq.s32.totalorder %s2178_s13, 1 }
 0x19a   : > { %p1378_p12 = pnand %p1377_p11, %p1254_p8 }
 0x19b   : > { %v1393_v6 = vld [vmem:[%s2673_s2] sm:$0x1] (!%p1378_p12)  ;;  %v1395_v16 = vld [vmem:[%s2673_s2 + $0x1] sm:$0x1] (!%p1378_p12)  ;;  %vm1401_vm3 = vcmask (!%p1378_p12), 1040384  }
 0x19c   : > { %1383 = sbr.rel (%p1378_p12) target bundleno = 446 (0x1be), region = 44 }
 0x19e   : > { %v1384_v58 = vld [vmem:[#allocation2] sm:$0x1] (!%p1378_p12)  ;;  %v1386_v60 = vld [vmem:[#allocation2 + $0x1] sm:$0x1] (!%p1378_p12) }
 0x19f   : > { %v1385_v62 = vmul.f32 (!%p1378_p12), 0.001953125, %v1384_v58  ;;  %v1387_v63 = vmul.f32 (!%p1378_p12), 0.001953125, %v1386_v60 }
 0x1a1   : > { %v1388_v0 = vmul.f32 (!%p1378_p12), %v1385_v62, %v1385_v62 }
 0x1a3   : > { %v1389_v2 = vsub.f32 %v1387_v63, %v1388_v0 }
 0x1a5   : > { %v1390_v3 = vmax.f32 %v1389_v2, 0.0 }
 0x1a7   : > { %v1391_v5 = vadd.f32 0.001, %v1390_v3 }
 0x1a9   : > { %2150 = vrsqrt.f32 %v1391_v5 }
 0x1b3   : > { %v2151_v10 = vpop.eup %2150 }
 0x1b4   : > { %v1394_v14 = vmul.f32 %v2151_v10, %v1393_v6 }
 0x1b6   : > { %v1396_v18 = vmul.f32 %v1394_v14, %v1385_v62 }
 0x1b8   : > { %v1397_v22 = vsub.f32 %v1395_v16, %v1396_v18 }
 0x1ba   : > { %v1399_v24 = vrot.slane %v1397_v22, 7 }
 0x1bc   : > { %v1402_v28 = vsel %vm1401_vm3, %v1394_v14, %v1399_v24 }
 0x1bd   : > { %1403 = vst [vmem:[#allocation3] sm:$0x3] %v1402_v28 }
 0x1be PF: > { %p1828_p13 = scmp.ne.s32.totalorder %s2178_s13, 1 }
 0x1c0   : > { %1406 = sbr.rel (%p1828_p13) target bundleno = 587 (0x24b), region = 48 }
 0x1c4   : > { %v2554_v30 = vld [vmem:[#allocation3] ss:$0 sm:$0xff] (!%p1828_p13)  ;;  %v2556_v34 = vld [vmem:[#allocation3 + $0x1] ss:$0 sm:$0xff] (!%p1828_p13) }
 0x1c5   : > { %v1428_v38 = vmul.f32 (!%p1828_p13), %v2415_v44, %v2554_v30  ;;  %v1412_v39 = vmul.f32 (!%p1828_p13), %v2383_v9, %v2554_v30  ;;  %v1429_v40 = vmul.f32 (!%p1828_p13), %v2419_v49, %v2554_v30  ;;  %v1413_v42 = vmul.f32 (!%p1828_p13), %v2387_v13, %v2554_v30 }
 0x1c6   : > { %v1430_v46 = vmul.f32 (!%p1828_p13), %v2413_v41, %v2554_v30  ;;  %v1414_v9 = vmul.f32 (!%p1828_p13), %v2381_v7, %v2554_v30  ;;  %v1431_v49 = vmul.f32 (!%p1828_p13), %v2417_v47, %v2554_v30  ;;  %v1415_v41 = vmul.f32 (!%p1828_p13), %v2385_v11, %v2554_v30 }
 0x1c7   : > { %v1465_v43 = vadd.f32 %v2556_v34, %v1428_v38  ;;  %v1449_v45 = vadd.f32 %v2556_v34, %v1412_v39  ;;  %v1466_v44 = vadd.f32 %v2556_v34, %v1429_v40  ;;  %v1450_v48 = vadd.f32 %v2556_v34, %v1413_v42 }
 0x1c8   : > { %v1467_v13 = vadd.f32 %v2556_v34, %v1430_v46  ;;  %v1451_v50 = vadd.f32 %v2556_v34, %v1414_v9  ;;  %v1468_v51 = vadd.f32 %v2556_v34, %v1431_v49  ;;  %v1452_v52 = vadd.f32 %v2556_v34, %v1415_v41 }
 0x1c9   : > { %1513 = vxpose.xlu1.b32.start [1/16] (narrow) %v1465_v43, 8  ;;  %1481 = vxpose.xlu0.b32.start [1/16] (narrow) %v1449_v45, 8  ;;  %v1432_v7 = vmul.f32 %v2423_v56, %v2554_v30  ;;  %v1416_v47 = vmul.f32 %v2391_v17, %v2554_v30  ;;  %v1433_v54 = vmul.f32 %v2427_v61, %v2554_v30 }
 0x1ca   : > { %v1417_v57 = vmul.f32 %v2395_v21, %v2554_v30  ;;  %v1434_v58 = vmul.f32 %v2421_v53, %v2554_v30  ;;  %v1418_v61 = vmul.f32 %v2389_v15, %v2554_v30  ;;  %v1435_v60 = vmul.f32 %v2425_v59, %v2554_v30 }
 0x1cb   : > { %v1469_v55 = vadd.f32 %v2556_v34, %v1432_v7  ;;  %v1453_v11 = vadd.f32 %v2556_v34, %v1416_v47  ;;  %v1470_v56 = vadd.f32 %v2556_v34, %v1433_v54  ;;  %v1419_v53 = vmul.f32 %v2393_v19, %v2554_v30 }
 0x1cc   : > { %v1454_v17 = vadd.f32 %v2556_v34, %v1417_v57  ;;  %v1471_v62 = vadd.f32 %v2556_v34, %v1434_v58  ;;  %v1455_v21 = vadd.f32 %v2556_v34, %v1418_v61  ;;  %v1472_v63 = vadd.f32 %v2556_v34, %v1435_v60 }
 0x1cd   : > { %1514 = vxpose.xlu1.b32.cont [2/16] (narrow) %v1466_v44, 8  ;;  %1482 = vxpose.xlu0.b32.cont [2/16] (narrow) %v1450_v48, 8  ;;  %v1456_v0 = vadd.f32 %v2556_v34, %v1419_v53  ;;  %v1436_v15 = vmul.f32 %v2431_v4, %v2554_v30  ;;  %v1420_v59 = vmul.f32 %v2399_v25, %v2554_v30 }
 0x1ce   : > { %v1437_v2 = vmul.f32 %v2435_v12, %v2554_v30  ;;  %v1421_v5 = vmul.f32 %v2403_v29, %v2554_v30  ;;  %v1438_v6 = vmul.f32 %v2429_v1, %v2554_v30  ;;  %v1422_v12 = vmul.f32 %v2397_v23, %v2554_v30 }
 0x1cf   : > { %v1473_v3 = vadd.f32 %v2556_v34, %v1436_v15  ;;  %v1457_v19 = vadd.f32 %v2556_v34, %v1420_v59  ;;  %v1439_v10 = vmul.f32 %v2433_v8, %v2554_v30  ;;  %v1423_v1 = vmul.f32 %v2401_v27, %v2554_v30 }
 0x1d0   : > { %v1474_v4 = vadd.f32 %v2556_v34, %v1437_v2  ;;  %v1458_v25 = vadd.f32 %v2556_v34, %v1421_v5  ;;  %v1475_v14 = vadd.f32 %v2556_v34, %v1438_v6  ;;  %v1459_v29 = vadd.f32 %v2556_v34, %v1422_v12 }
 0x1d1   : > { %1515 = vxpose.xlu1.b32.cont [3/16] (narrow) %v1467_v13, 8  ;;  %1483 = vxpose.xlu0.b32.cont [3/16] (narrow) %v1451_v50, 8  ;;  %v1476_v16 = vadd.f32 %v2556_v34, %v1439_v10  ;;  %v1460_v18 = vadd.f32 %v2556_v34, %v1423_v1  ;;  %v1440_v23 = vmul.f32 %v2439_v26, %v2554_v30 }
 0x1d2   : > { %v1424_v8 = vmul.f32 %v2407_v33, %v2554_v30  ;;  %v1441_v22 = vmul.f32 %v2443_v36, %v2554_v30  ;;  %v1425_v28 = vmul.f32 %v2411_v37, %v2554_v30  ;;  %v1442_v38 = vmul.f32 %v2437_v20, %v2554_v30 }
 0x1d3   : > { %v1477_v24 = vadd.f32 %v2556_v34, %v1440_v23  ;;  %v1426_v36 = vmul.f32 %v2405_v31, %v2554_v30  ;;  %v1443_v39 = vmul.f32 %v2441_v32, %v2554_v30  ;;  %v1427_v40 = vmul.f32 %v2409_v35, %v2554_v30 }
 0x1d4   : > { %v1461_v27 = vadd.f32 %v2556_v34, %v1424_v8  ;;  %v1478_v26 = vadd.f32 %v2556_v34, %v1441_v22  ;;  %v1462_v33 = vadd.f32 %v2556_v34, %v1425_v28  ;;  %v1479_v37 = vadd.f32 %v2556_v34, %v1442_v38 }
 0x1d5   : > { %1516 = vxpose.xlu1.b32.cont [4/16] (narrow) %v1468_v51, 8  ;;  %1484 = vxpose.xlu0.b32.cont [4/16] (narrow) %v1452_v52, 8  ;;  %v1463_v20 = vadd.f32 %v2556_v34, %v1426_v36  ;;  %v1480_v42 = vadd.f32 %v2556_v34, %v1443_v39  ;;  %v1464_v43 = vadd.f32 %v2556_v34, %v1427_v40 }
 0x1d9   : > { %1517 = vxpose.xlu1.b32.cont [5/16] (narrow) %v1469_v55, 8  ;;  %1485 = vxpose.xlu0.b32.cont [5/16] (narrow) %v1453_v11, 8 }
 0x1dd   : > { %1518 = vxpose.xlu1.b32.cont [6/16] (narrow) %v1470_v56, 8  ;;  %1486 = vxpose.xlu0.b32.cont [6/16] (narrow) %v1454_v17, 8 }
 0x1e1   : > { %1519 = vxpose.xlu1.b32.cont [7/16] (narrow) %v1471_v62, 8  ;;  %1487 = vxpose.xlu0.b32.cont [7/16] (narrow) %v1455_v21, 8 }
 0x1e5   : > { %1520 = vxpose.xlu1.b32.cont [8/16] (narrow) %v1472_v63, 8  ;;  %1488 = vxpose.xlu0.b32.cont [8/16] (narrow) %v1456_v0, 8 }
 0x1e9   : > { %1521 = vxpose.xlu1.b32.cont [9/16] (narrow) %v1473_v3, 8  ;;  %1489 = vxpose.xlu0.b32.cont [9/16] (narrow) %v1457_v19, 8 }
 0x1ed   : > { %1522 = vxpose.xlu1.b32.cont [10/16] (narrow) %v1474_v4, 8  ;;  %1490 = vxpose.xlu0.b32.cont [10/16] (narrow) %v1458_v25, 8 }
 0x1f1   : > { %1523 = vxpose.xlu1.b32.cont [11/16] (narrow) %v1475_v14, 8  ;;  %1491 = vxpose.xlu0.b32.cont [11/16] (narrow) %v1459_v29, 8 }
 0x1f5   : > { %1524 = vxpose.xlu1.b32.cont [12/16] (narrow) %v1476_v16, 8  ;;  %1492 = vxpose.xlu0.b32.cont [12/16] (narrow) %v1460_v18, 8 }
 0x1f9   : > { %1525 = vxpose.xlu1.b32.cont [13/16] (narrow) %v1477_v24, 8  ;;  %1493 = vxpose.xlu0.b32.cont [13/16] (narrow) %v1461_v27, 8 }
 0x1fd   : > { %1526 = vxpose.xlu1.b32.cont [14/16] (narrow) %v1478_v26, 8  ;;  %1494 = vxpose.xlu0.b32.cont [14/16] (narrow) %v1462_v33, 8 }
 0x201   : > { %1527 = vxpose.xlu1.b32.cont [15/16] (narrow) %v1479_v37, 8  ;;  %1495 = vxpose.xlu0.b32.cont [15/16] (narrow) %v1463_v20, 8 }
 0x205   : > { %1528 = vxpose.xlu1.b32.end [16/16] (narrow) %v1480_v42, 8  ;;  %1496 = vxpose.xlu0.b32.end [16/16] (narrow) %v1464_v43, 8 }
 0x249   : > { %v1529_v31 = vpop.trf.xlu1  ;;  %v1497_v45 = vpop.trf.xlu0 }
 0x24a   : > { %1546 = vst [vmem:[%s2269_s4 + $0x8] sm:$0xff] %v1529_v31  ;;  %1545 = vst [vmem:[%s2269_s4] sm:$0xff] %v1497_v45 }
 0x24b PF: > { %s13_s16 = sadd.s32 1, %s2190_s16   ;;  %s2676_s12 = smov %s2182_s14 }
 0x24c   : > { %p10_p0 = scmp.ge.s32.totalorder %s13_s16, 6   ;;  %s2677_s13 = smov %s2186_s15 }
 0x24d   : > { %s2678_s14 = smov %s2681_s17  ;;  %s2679_s15 = smov %s2685_s18 }
 0x24e   :  { %12 = sbr.rel (!%p10_p0) target bundleno = 3 (0x3), region = 83 }

</bundles_post_ra>
